<compile_context>
chip_gen: v7x
topology: tpu7x:2x2x1
jax: 0.10.0
libtpu: 0.0.40
codegen_flags: <defaults>
</compile_context>

<pallas_src>
import functools

import jax
import jax.numpy as jnp
from jax.experimental import pallas as pl
from jax.experimental.pallas import tpu as pltpu

CONFIG = [(32, 3, 1), (64, 3, 2), ['B', 1], (128, 3, 2), ['B', 2], (256, 3, 2),
          ['B', 8], (512, 3, 2), ['B', 8], (1024, 3, 2), ['B', 4], (512, 1, 1),
          (1024, 3, 1), 'S', (256, 1, 1), 'U', (256, 1, 1), (512, 3, 1), 'S',
          (128, 1, 1), 'U', (128, 1, 1), (256, 3, 1), 'S']

BN_EPS = 1e-5
LEAKY_SLOPE = 0.1
VMEM_LIMIT = 48 * 1024 * 1024

_CHIP_CACHE = None


def _chip():
    """(mxu_width, tensorcores_per_chip) detected from the local device."""
    global _CHIP_CACHE
    if _CHIP_CACHE is None:
        mxu, cores = 128, 1
        try:
            kind = jax.devices()[0].device_kind.lower()
            if ("v6" in kind) or ("v7" in kind) or ("tpu7" in kind):
                mxu = 256                       # 2x256x256 MXU
            if ("v4" in kind) or ("v5p" in kind) or ("v7" in kind) or ("tpu7" in kind):
                cores = 2                       # 2 TensorCores share the grid
        except Exception:
            pass
        _CHIP_CACHE = (mxu, cores)
    return _CHIP_CACHE


def _round_up(x, m):
    return ((x + m - 1) // m) * m


def _tile(dim, target, quantum):
    """Largest multiple of `quantum` <= target dividing `dim`; `dim` itself if
    small or if no such divisor exists (a full-extent block is always legal)."""
    if dim <= target:
        return dim
    t = max((target // quantum) * quantum, quantum)
    while t > 0 and dim % t:
        t -= quantum
    return t if t > 0 else dim


def _pick_tiles(m, k, n, mxu, cores):
    """Adaptive matmul tiles.  K/N tiles are multiples of 128 (256-aligned on
    256-wide-MXU chips) unless they span the full dimension."""
    def kn_tile(dim, target):
        if dim <= target or dim % 128:
            return dim                           # full-extent block
        q = mxu if dim % mxu == 0 else 128
        return _tile(dim, target, q)

    if m <= 128:
        tm = m
        tk = kn_tile(k, 1024)
        if cores >= 2 and n % 256 == 0 and n >= 512:
            tn = kn_tile(n, max(n // 2, 256))    # keep both TensorCores busy
        else:
            tn = kn_tile(n, 512)
    else:
        tm = _tile(m, 512, 8) if m % 8 == 0 else m
        tk = kn_tile(k, 1024)
        tn = kn_tile(n, 512)
        if cores >= 2 and (m // tm) == 1 and (n // tn) == 1 and tm % 16 == 0:
            tm //= 2                             # >=2 parallel blocks on 2-TC chips
    return tm, tn, tk


# ----------------------------- Pallas kernels ------------------------------

def _mm_stats_kernel(a_ref, b_ref, y_ref, ps_ref, pq_ref, acc_ref, *, inv_rows):
    """C = A @ B (bf16 x bf16 -> f32 acc); bf16 writeback.  The epilogue also
    emits per-column (sum, centered sum-of-squares) from the f32 accumulator so
    BatchNorm statistics need no extra HBM pass."""
    k = pl.program_id(2)

    @pl.when(k == 0)
    def _():
        acc_ref[...] = jnp.zeros_like(acc_ref)

    acc_ref[...] += jnp.dot(a_ref[...], b_ref[...],
                            preferred_element_type=jnp.float32)

    @pl.when(k == pl.num_programs(2) - 1)
    def _():
        y = acc_ref[...]
        y_ref[...] = y.astype(y_ref.dtype)
        s = jnp.sum(y, axis=0, keepdims=True)          # (1, tn)
        c = s * inv_rows                               # per-column block center
        ps_ref[...] = s[None]
        pq_ref[...] = jnp.sum((y - c) * (y - c), axis=0, keepdims=True)[None]


def _conv3x3_row_kernel(x_ref, w_ref, y_ref, ps_ref, pq_ref, acc_ref,
                        *, wo, inv_rows):
    """3x3 stride-1 conv, one output row per grid step.  The padded input row
    (y0+dy) arrives via the BlockSpec (dy = reduction grid axis); the three dx
    shifts are sliced in VMEM -- no im2col buffer in HBM."""
    d = pl.program_id(3)

    @pl.when(d == 0)
    def _():
        acc_ref[...] = jnp.zeros_like(acc_ref)

    row = x_ref[0, 0]                                  # (Wp, C) bf16
    for dx in range(3):
        a = row[dx:dx + wo, :]                         # (Wo, C), static slice
        acc_ref[...] += jnp.dot(a, w_ref[0, dx],
                                preferred_element_type=jnp.float32)

    @pl.when(d == pl.num_programs(3) - 1)
    def _():
        y = acc_ref[...]                               # (Wo, tn) f32
        y_ref[0, 0] = y.astype(y_ref.dtype)
        s = jnp.sum(y, axis=0, keepdims=True)
        c = s * inv_rows
        ps_ref[0, 0] = s
        pq_ref[0, 0] = jnp.sum((y - c) * (y - c), axis=0, keepdims=True)


def _mm_bias_kernel(a_ref, b_ref, bias_ref, o_ref, acc_ref):
    """C = A @ B + bias (no-BN path, final prediction conv)."""
    k = pl.program_id(2)

    @pl.when(k == 0)
    def _():
        acc_ref[...] = jnp.zeros_like(acc_ref)

    acc_ref[...] += jnp.dot(a_ref[...], b_ref[...],
                            preferred_element_type=jnp.float32)

    @pl.when(k == pl.num_programs(2) - 1)
    def _():
        o_ref[...] = acc_ref[...] + bias_ref[...]


def _bn_act_kernel(y_ref, s_ref, b_ref, o_ref, *, slope):
    out = y_ref[...].astype(jnp.float32) * s_ref[...] + b_ref[...]
    out = jnp.where(out >= 0, out, slope * out)        # LeakyReLU(0.1)
    o_ref[...] = out.astype(o_ref.dtype)


def _bn_act_res_kernel(y_ref, s_ref, b_ref, r_ref, o_ref, *, slope):
    out = y_ref[...].astype(jnp.float32) * s_ref[...] + b_ref[...]
    out = jnp.where(out >= 0, out, slope * out)        # LeakyReLU(0.1)
    o_ref[...] = (r_ref[...].astype(jnp.float32) + out).astype(o_ref.dtype)


# ----------------------------- kernel wrappers ------------------------------

def conv_mm_stats(a, b):
    """a: (M, K) bf16, b: (K, Cout) bf16 -> (y bf16, per-block sums, per-block
    centered sumsq, block_rows)."""
    m, k = a.shape
    _, n = b.shape
    mxu, cores = _chip()
    tm, tn, tk = _pick_tiles(m, k, n, mxu, cores)
    gi, gj, gk = m // tm, n // tn, k // tk
    cost = pl.CostEstimate(
        flops=int(2 * m * k * n), transcendentals=0,
        bytes_accessed=int(2 * (m * k * gj + k * n * gi + m * n)))
    y, ps, pq = pl.pallas_call(
        functools.partial(_mm_stats_kernel, inv_rows=1.0 / tm),
        out_shape=(jax.ShapeDtypeStruct((m, n), jnp.bfloat16),
                   jax.ShapeDtypeStruct((gi, 1, n), jnp.float32),
                   jax.ShapeDtypeStruct((gi, 1, n), jnp.float32)),
        grid_spec=pltpu.PrefetchScalarGridSpec(
            num_scalar_prefetch=0,
            grid=(gi, gj, gk),
            in_specs=[
                pl.BlockSpec((tm, tk), lambda i, j, kk: (i, kk)),
                pl.BlockSpec((tk, tn), lambda i, j, kk: (kk, j)),
            ],
            out_specs=[
                pl.BlockSpec((tm, tn), lambda i, j, kk: (i, j)),
                pl.BlockSpec((1, 1, tn), lambda i, j, kk: (i, 0, j)),
                pl.BlockSpec((1, 1, tn), lambda i, j, kk: (i, 0, j)),
            ],
            scratch_shapes=[pltpu.VMEM((tm, tn), jnp.float32)],
        ),
        compiler_params=pltpu.CompilerParams(
            dimension_semantics=("parallel", "parallel", "arbitrary"),
            vmem_limit_bytes=VMEM_LIMIT),
        cost_estimate=cost,
    )(a, b)
    return y, ps, pq, tm


def conv3x3_row(xp, w):
    """xp: (N, H+2, W+2, C) spatially pre-padded bf16; w: (3, 3, C, Cout) bf16.
    Returns (y (N,H,W,Cout) bf16, per-row sums, per-row centered sumsq)."""
    n, hp, wp, c = xp.shape
    ho, wo = hp - 2, wp - 2
    cout = w.shape[-1]
    tn = cout if cout <= 512 else 512
    gj = cout // tn
    cost = pl.CostEstimate(
        flops=int(2 * n * ho * wo * 9 * c * cout), transcendentals=0,
        bytes_accessed=int(n * ho * (3 * gj * wp * c * 2 + 9 * c * cout * 2)
                           + n * ho * wo * cout * 2))
    y, ps, pq = pl.pallas_call(
        functools.partial(_conv3x3_row_kernel, wo=wo, inv_rows=1.0 / wo),
        out_shape=(jax.ShapeDtypeStruct((n, ho, wo, cout), jnp.bfloat16),
                   jax.ShapeDtypeStruct((n, ho, 1, cout), jnp.float32),
                   jax.ShapeDtypeStruct((n, ho, 1, cout), jnp.float32)),
        grid_spec=pltpu.PrefetchScalarGridSpec(
            num_scalar_prefetch=0,
            grid=(n, ho, gj, 3),
            in_specs=[
                pl.BlockSpec((1, 1, wp, c), lambda b, i, j, d: (b, i + d, 0, 0)),
                pl.BlockSpec((1, 3, c, tn), lambda b, i, j, d: (d, 0, 0, j)),
            ],
            out_specs=[
                pl.BlockSpec((1, 1, wo, tn), lambda b, i, j, d: (b, i, 0, j)),
                pl.BlockSpec((1, 1, 1, tn), lambda b, i, j, d: (b, i, 0, j)),
                pl.BlockSpec((1, 1, 1, tn), lambda b, i, j, d: (b, i, 0, j)),
            ],
            scratch_shapes=[pltpu.VMEM((wo, tn), jnp.float32)],
        ),
        compiler_params=pltpu.CompilerParams(
            dimension_semantics=("parallel", "parallel", "parallel", "arbitrary"),
            vmem_limit_bytes=VMEM_LIMIT),
        cost_estimate=cost,
    )(xp, w)
    return y, ps, pq


def conv_mm_bias(a, b, bias):
    """a: (M, K) bf16, b: (K, Cout) bf16, bias: (1, Cout) f32 -> (M, Cout) f32."""
    m, k = a.shape
    _, n = b.shape
    mxu, cores = _chip()
    tm, tn, tk = _pick_tiles(m, k, n, mxu, cores)
    gi, gj, gk = m // tm, n // tn, k // tk
    cost = pl.CostEstimate(
        flops=int(2 * m * k * n), transcendentals=0,
        bytes_accessed=int(2 * (m * k * gj + k * n * gi) + 4 * m * n))
    return pl.pallas_call(
        _mm_bias_kernel,
        out_shape=jax.ShapeDtypeStruct((m, n), jnp.float32),
        grid_spec=pltpu.PrefetchScalarGridSpec(
            num_scalar_prefetch=0,
            grid=(gi, gj, gk),
            in_specs=[
                pl.BlockSpec((tm, tk), lambda i, j, kk: (i, kk)),
                pl.BlockSpec((tk, tn), lambda i, j, kk: (kk, j)),
                pl.BlockSpec((1, tn), lambda i, j, kk: (0, j)),
            ],
            out_specs=pl.BlockSpec((tm, tn), lambda i, j, kk: (i, j)),
            scratch_shapes=[pltpu.VMEM((tm, tn), jnp.float32)],
        ),
        compiler_params=pltpu.CompilerParams(
            dimension_semantics=("parallel", "parallel", "arbitrary"),
            vmem_limit_bytes=VMEM_LIMIT),
        cost_estimate=cost,
    )(a, b, bias)


def bn_act(y, scale, shift, resid=None):
    """Tiled scale/shift + LeakyReLU (+ fused residual add), bf16 in/out."""
    m, c = y.shape
    target = max(512, min(2048, (2 << 20) // max(2 * c, 1)))
    tbm = _tile(m, target, 8) if m % 8 == 0 else m
    grid = (m // tbm,)
    row_spec = pl.BlockSpec((tbm, c), lambda i: (i, 0))
    vec_spec = pl.BlockSpec((1, c), lambda i: (0, 0))
    if resid is None:
        kernel = functools.partial(_bn_act_kernel, slope=LEAKY_SLOPE)
        in_specs = [row_spec, vec_spec, vec_spec]
        args = (y, scale, shift)
    else:
        kernel = functools.partial(_bn_act_res_kernel, slope=LEAKY_SLOPE)
        in_specs = [row_spec, vec_spec, vec_spec, row_spec]
        args = (y, scale, shift, resid)
    return pl.pallas_call(
        kernel,
        out_shape=jax.ShapeDtypeStruct((m, c), jnp.bfloat16),
        grid=grid,
        in_specs=in_specs,
        out_specs=row_spec,
        compiler_params=pltpu.CompilerParams(
            dimension_semantics=("parallel",),
            vmem_limit_bytes=VMEM_LIMIT),
    )(*args)


# ------------------------------ conv plumbing ------------------------------

def _im2col_nhwc(x, k, stride, pad):
    """x: NHWC -> patches (N*Ho*Wo, k*k*C), K ordered as (ky, kx, Cin).  Only
    used for 1x1 convs (pure reshape) and layers where in-kernel patch
    formation loses (strided / deep small-spatial layers)."""
    n, h, w, c = x.shape
    if k == 1 and stride == 1 and pad == 0:
        return x.reshape(n * h * w, c), h, w
    xp = jnp.pad(x, ((0, 0), (pad, pad), (pad, pad), (0, 0)))
    ho = (h + 2 * pad - k) // stride + 1
    wo = (w + 2 * pad - k) // stride + 1
    cols = [xp[:, dy:dy + stride * ho:stride, dx:dx + stride * wo:stride, :]
            for dy in range(k) for dx in range(k)]
    patches = jnp.concatenate(cols, axis=-1)
    return patches.reshape(n * ho * wo, k * k * c), ho, wo


def _prefer_row_conv(n, h, w, cin, cout):
    """Static HBM-traffic estimate: in-kernel row conv vs XLA im2col + matmul."""
    w_bytes = 9 * cin * cout * 2
    in_bytes = n * (h + 2) * (w + 2) * cin * 2
    rows = n * h * w
    gj = max(1, -(-cout // 512))
    row_cost = n * h * w_bytes + 3 * gj * in_bytes
    patch_bytes = rows * 9 * cin * 2
    patch_cost = 2 * patch_bytes + max(1, -(-rows // 512)) * w_bytes
    return row_cost < patch_cost


def _finalize_stats(ps, pq, block_rows, m):
    """Combine per-block (sum, centered sum-of-squares) into batch mean / biased
    variance (Chan-style combine; avoids E[y^2]-E[y]^2 cancellation)."""
    c_dim = ps.shape[-1]
    ps = ps.reshape(-1, c_dim)
    pq = pq.reshape(-1, c_dim)
    mean = jnp.sum(ps, axis=0) / m
    ctr = ps * (1.0 / block_rows)                # same center as used in-kernel
    dev = ctr - mean[None, :]
    m2 = pq + 2.0 * dev * (ps - block_rows * ctr) + block_rows * (dev * dev)
    var = jnp.maximum(jnp.sum(m2, axis=0) / m, 0.0)
    return mean, var


def conv_block(x, p, stride, padding, skip=None):
    """CNNBlock on NHWC bf16 input.  BN layers: conv -> BN(batch stats) ->
    LeakyReLU (+ optional fused residual add).  No-BN layers: conv + bias."""
    n, h, w, cin = x.shape
    k, cout = p['k'], p['cout']

    if not p['bn']:
        a, ho, wo = _im2col_nhwc(x, k, stride, padding)
        out = conv_mm_bias(a, p['w'].reshape(-1, cout), p['bias'])
        return out.reshape(n, ho, wo, cout)

    if (k == 3 and stride == 1 and padding == 1 and cin >= 8
            and _prefer_row_conv(n, h, w, cin, cout)):
        # In-kernel patch formation: no 9x im2col buffer in HBM.
        xp = jnp.pad(x, ((0, 0), (1, 1), (1, 1), (0, 0)))
        y4, ps, pq = conv3x3_row(xp, p['w'])
        ho, wo = h, w
        m = n * ho * wo
        y = y4.reshape(m, cout)
        block_rows = wo
    else:
        a, ho, wo = _im2col_nhwc(x, k, stride, padding)
        m = a.shape[0]
        y, ps, pq, block_rows = conv_mm_stats(a, p['w'].reshape(-1, cout))

    mean, var = _finalize_stats(ps, pq, block_rows, m)
    scale = p['gamma'] * jax.lax.rsqrt(var + BN_EPS)
    shift = p['beta'] - mean * scale
    r2d = skip.reshape(m, cout) if skip is not None else None
    out = bn_act(y, scale[None, :], shift[None, :], r2d)
    return out.reshape(n, ho, wo, cout)


def upsample2_nhwc(x):
    # TODO(synk): fuse nearest 2x upsample + channel concat into the following
    # 1x1 conv's A-operand index_map (or a single Pallas copy kernel) to remove
    # these extra HBM passes; kept in plain JAX here.
    return jnp.repeat(jnp.repeat(x, 2, axis=1), 2, axis=2)


# ------------------------------- parameters --------------------------------

def _init_cnn(key, cin, cout, k, bn=True):
    kw, kb, kg, kbe = jax.random.split(key, 4)
    std = (2.0 / (cin * k * k)) ** 0.5
    w = std * jax.random.normal(kw, (cout, cin, k, k), jnp.float32)
    # (ky, kx, Cin, Cout) bf16; the patch path uses the free reshape to
    # (k*k*Cin, Cout).  No K/Cout padding anywhere.
    wr = jnp.transpose(w, (2, 3, 1, 0)).astype(jnp.bfloat16)
    p = {'w': wr, 'k': k, 'cin': cin, 'cout': cout, 'bn': bn}
    if bn:
        p['gamma'] = 1.0 + 0.1 * jax.random.normal(kg, (cout,), jnp.float32)
        p['beta'] = 0.1 * jax.random.normal(kbe, (cout,), jnp.float32)
    else:
        p['bias'] = (0.05 * jax.random.normal(kb, (cout,), jnp.float32))[None, :]
    return p


def build_yolov3(key, in_channels=3, num_classes=80):
    keys = iter(jax.random.split(key, 256))
    nk = lambda: next(keys)
    layers = []
    # Pad the stem's input channels to a lane-friendly count.  The extra input
    # channels are zero-filled activations, so the forward pass is unchanged.
    cin = in_channels if in_channels % 8 == 0 else _round_up(in_channels, 32)
    for module in CONFIG:
        if isinstance(module, tuple):
            cout, k, s = module
            layers.append(('cnn', _init_cnn(nk(), cin, cout, k, True), s,
                           1 if k == 3 else 0))
            cin = cout
        if isinstance(module, list):
            nrep = module[1]
            reps = [(_init_cnn(nk(), cin, cin // 2, 1, True),
                     _init_cnn(nk(), cin // 2, cin, 3, True))
                    for _ in range(nrep)]
            layers.append(('res', reps, True, nrep))
        if isinstance(module, str):
            if module == 'S':
                reps = [(_init_cnn(nk(), cin, cin // 2, 1, True),
                         _init_cnn(nk(), cin // 2, cin, 3, True))]
                layers.append(('res', reps, False, 1))
                layers.append(('cnn', _init_cnn(nk(), cin, cin // 2, 1, True), 1, 0))
                sp1 = _init_cnn(nk(), cin // 2, cin, 3, True)
                sp2 = _init_cnn(nk(), cin, (num_classes + 5) * 3, 1, False)
                layers.append(('scale', (sp1, sp2), num_classes))
                cin = cin // 2
            elif module == 'U':
                layers.append(('up',))
                cin = cin * 3
    return layers


# --------------------------------- forward ---------------------------------

def yolov3_forward(layers, x):
    """x: NCHW f32 (PyTorch convention).  Internally NHWC bf16 end-to-end."""
    x = jnp.transpose(x, (0, 2, 3, 1)).astype(jnp.bfloat16)   # single layout change
    cin0 = layers[0][1]['cin']
    if x.shape[-1] != cin0:                                    # stem lane padding
        x = jnp.pad(x, ((0, 0), (0, 0), (0, 0), (0, cin0 - x.shape[-1])))
    outputs = []
    routes = []
    for layer in layers:
        kind = layer[0]
        if kind == 'scale':
            _, (sp1, sp2), nc = layer
            y = conv_block(x, sp1, 1, 1)
            y = conv_block(y, sp2, 1, 0)                       # (N,H,W,3*(nc+5)) f32
            n, h, w, _ = y.shape
            outputs.append(y.reshape(n, h, w, 3, nc + 5).transpose(0, 3, 1, 2, 4))
            continue
        if kind == 'cnn':
            _, p, s, pad = layer
            x = conv_block(x, p, s, pad)
        elif kind == 'res':
            _, reps, use_res, nrep = layer
            for (p1, p2) in reps:
                y = conv_block(x, p1, 1, 0)
                # residual add fused into the BN+LeakyReLU kernel of conv2
                x = conv_block(y, p2, 1, 1, skip=x if use_res else None)
            if use_res and nrep == 8:
                routes.append(x)
        elif kind == 'up':
            x = upsample2_nhwc(x)
            x = jnp.concatenate([x, routes.pop()], axis=-1)    # channel concat (NHWC)
    return outputs


# ----------------------------------- main -----------------------------------

if __name__ == "__main__":
    num_classes = 80
    key = jax.random.PRNGKey(0)
    pkey, xkey = jax.random.split(key)
    layers = build_yolov3(pkey, in_channels=3, num_classes=num_classes)

    # smallest spatial size compatible with 5 stride-2 downsamples: 32x32
    x = jax.random.normal(xkey, (2, 3, 32, 32), jnp.float32)

    outs = yolov3_forward(layers, x)
    outs = jax.block_until_ready(outs)

    expected = [(2, 3, 1, 1, num_classes + 5),
                (2, 3, 2, 2, num_classes + 5),
                (2, 3, 4, 4, num_classes + 5)]
    assert [tuple(o.shape) for o in outs] == expected, [o.shape for o in outs]
    assert all(bool(jnp.all(jnp.isfinite(o.astype(jnp.float32)))) for o in outs)
    print("KERNEL_OK")
</pallas_src>

<mosaic_0001>
module attributes {stable_mosaic.version = 11 : i64} {
  func.func @_conv3x3_row_kernel(%arg0: i32, %arg1: i32, %arg2: i32, %arg3: i32, %arg4: memref<1x1x34x32xbf16, #tpu.memory_space<vmem>>, %arg5: memref<1x3x32x32xbf16, #tpu.memory_space<vmem>>, %arg6: memref<1x1x32x32xbf16, #tpu.memory_space<vmem>>, %arg7: memref<1x1x1x32xf32, #tpu.memory_space<vmem>>, %arg8: memref<1x1x1x32xf32, #tpu.memory_space<vmem>>, %arg9: memref<32x32xf32, #tpu.memory_space<vmem>>) attributes {dimension_semantics = [#tpu.dimension_semantics<parallel>, #tpu.dimension_semantics<parallel>, #tpu.dimension_semantics<parallel>, #tpu.dimension_semantics<arbitrary>], iteration_bounds = array<i64: 2, 32, 1, 3>, scalar_prefetch = 0 : i64, scratch_operands = 1 : i64, tpu.core_type = #tpu.core_type<tc>, window_params = [{transform_indices = @transform_0, window_bounds = array<i64: 1, 1, 34, 32>}, {transform_indices = @transform_1, window_bounds = array<i64: 1, 3, 32, 32>}, {transform_indices = @transform_2, window_bounds = array<i64: 1, 1, 32, 32>}, {transform_indices = @transform_3, window_bounds = array<i64: 1, 1, 1, 32>}, {transform_indices = @transform_4, window_bounds = array<i64: 1, 1, 1, 32>}]} {
    %c0_i32 = arith.constant 0 : i32
    %0 = arith.cmpi eq, %arg3, %c0_i32 : i32
    %1 = arith.extui %0 : i1 to i32
    %c0_i32_0 = arith.constant 0 : i32
    %2 = arith.cmpi ne, %1, %c0_i32_0 : i32
    scf.if %2 {
      %cst_29 = arith.constant 0.000000e+00 : f32
      %29 = vector.broadcast %cst_29 : f32 to vector<32x32xf32>
      %c0_30 = arith.constant 0 : index
      %c0_31 = arith.constant 0 : index
      %30 = vector.load %arg9[%c0_30, %c0_31] : memref<32x32xf32, #tpu.memory_space<vmem>>, vector<32x32xf32>
      tpu.vector_store %arg9[%c0_30, %c0_31], %29 {strides = array<i32>} : memref<32x32xf32, #tpu.memory_space<vmem>>, vector<32x32xf32>,
    } else {
    }
    %c0 = arith.constant 0 : index
    %c0_1 = arith.constant 0 : index
    %c0_2 = arith.constant 0 : index
    %c0_3 = arith.constant 0 : index
    %3 = vector.load %arg4[%c0, %c0_1, %c0_2, %c0_3] : memref<1x1x34x32xbf16, #tpu.memory_space<vmem>>, vector<1x1x34x32xbf16>
    %4 = vector.shape_cast %3 : vector<1x1x34x32xbf16> to vector<34x32xbf16>
    %5 = vector.extract_strided_slice %4 {offsets = [0, 0], sizes = [32, 32], strides = [1, 1]} : vector<34x32xbf16> to vector<32x32xbf16>
    %c0_4 = arith.constant 0 : index
    %c0_5 = arith.constant 0 : index
    %6 = vector.load %arg9[%c0_4, %c0_5] : memref<32x32xf32, #tpu.memory_space<vmem>>, vector<32x32xf32>
    %c0_6 = arith.constant 0 : index
    %c0_7 = arith.constant 0 : index
    %c0_8 = arith.constant 0 : index
    %c0_9 = arith.constant 0 : index
    %7 = vector.load %arg5[%c0_6, %c0_7, %c0_8, %c0_9] : memref<1x3x32x32xbf16, #tpu.memory_space<vmem>>, vector<1x1x32x32xbf16>
    %8 = vector.shape_cast %7 : vector<1x1x32x32xbf16> to vector<32x32xbf16>
    %cst = arith.constant dense<0.000000e+00> : vector<32x32xf32>
    %9 = tpu.matmul %5, %8, %cst {dimension_numbers = #tpu.dot_dimension_numbers<[1], [0], [0], [1], [0, 0, 1, 1], [], []>} : vector<32x32xbf16>, vector<32x32xbf16>, vector<32x32xf32> -> vector<32x32xf32>
    %10 = arith.addf %6, %9 : vector<32x32xf32>
    %c0_10 = arith.constant 0 : index
    %c0_11 = arith.constant 0 : index
    %11 = vector.load %arg9[%c0_10, %c0_11] : memref<32x32xf32, #tpu.memory_space<vmem>>, vector<32x32xf32>
    tpu.vector_store %arg9[%c0_10, %c0_11], %10 {strides = array<i32>} : memref<32x32xf32, #tpu.memory_space<vmem>>, vector<32x32xf32>,
    %12 = vector.extract_strided_slice %4 {offsets = [1, 0], sizes = [32, 32], strides = [1, 1]} : vector<34x32xbf16> to vector<32x32xbf16>
    %c0_12 = arith.constant 0 : index
    %c0_13 = arith.constant 0 : index
    %13 = vector.load %arg9[%c0_12, %c0_13] : memref<32x32xf32, #tpu.memory_space<vmem>>, vector<32x32xf32>
    %c0_14 = arith.constant 0 : index
    %c1 = arith.constant 1 : index
    %c0_15 = arith.constant 0 : index
    %c0_16 = arith.constant 0 : index
    %14 = vector.load %arg5[%c0_14, %c1, %c0_15, %c0_16] : memref<1x3x32x32xbf16, #tpu.memory_space<vmem>>, vector<1x1x32x32xbf16>
    %15 = vector.shape_cast %14 : vector<1x1x32x32xbf16> to vector<32x32xbf16>
    %cst_17 = arith.constant dense<0.000000e+00> : vector<32x32xf32>
    %16 = tpu.matmul %12, %15, %cst_17 {dimension_numbers = #tpu.dot_dimension_numbers<[1], [0], [0], [1], [0, 0, 1, 1], [], []>} : vector<32x32xbf16>, vector<32x32xbf16>, vector<32x32xf32> -> vector<32x32xf32>
    %17 = arith.addf %13, %16 : vector<32x32xf32>
    %c0_18 = arith.constant 0 : index
    %c0_19 = arith.constant 0 : index
    %18 = vector.load %arg9[%c0_18, %c0_19] : memref<32x32xf32, #tpu.memory_space<vmem>>, vector<32x32xf32>
    tpu.vector_store %arg9[%c0_18, %c0_19], %17 {strides = array<i32>} : memref<32x32xf32, #tpu.memory_space<vmem>>, vector<32x32xf32>,
    %19 = vector.extract_strided_slice %4 {offsets = [2, 0], sizes = [32, 32], strides = [1, 1]} : vector<34x32xbf16> to vector<32x32xbf16>
    %c0_20 = arith.constant 0 : index
    %c0_21 = arith.constant 0 : index
    %20 = vector.load %arg9[%c0_20, %c0_21] : memref<32x32xf32, #tpu.memory_space<vmem>>, vector<32x32xf32>
    %c0_22 = arith.constant 0 : index
    %c2 = arith.constant 2 : index
    %c0_23 = arith.constant 0 : index
    %c0_24 = arith.constant 0 : index
    %21 = vector.load %arg5[%c0_22, %c2, %c0_23, %c0_24] : memref<1x3x32x32xbf16, #tpu.memory_space<vmem>>, vector<1x1x32x32xbf16>
    %22 = vector.shape_cast %21 : vector<1x1x32x32xbf16> to vector<32x32xbf16>
    %cst_25 = arith.constant dense<0.000000e+00> : vector<32x32xf32>
    %23 = tpu.matmul %19, %22, %cst_25 {dimension_numbers = #tpu.dot_dimension_numbers<[1], [0], [0], [1], [0, 0, 1, 1], [], []>} : vector<32x32xbf16>, vector<32x32xbf16>, vector<32x32xf32> -> vector<32x32xf32>
    %24 = arith.addf %20, %23 : vector<32x32xf32>
    %c0_26 = arith.constant 0 : index
    %c0_27 = arith.constant 0 : index
    %25 = vector.load %arg9[%c0_26, %c0_27] : memref<32x32xf32, #tpu.memory_space<vmem>>, vector<32x32xf32>
    tpu.vector_store %arg9[%c0_26, %c0_27], %24 {strides = array<i32>} : memref<32x32xf32, #tpu.memory_space<vmem>>, vector<32x32xf32>,
    %c2_i32 = arith.constant 2 : i32
    %26 = arith.cmpi eq, %arg3, %c2_i32 : i32
    %27 = arith.extui %26 : i1 to i32
    %c0_i32_28 = arith.constant 0 : i32
    %28 = arith.cmpi ne, %27, %c0_i32_28 : i32
    scf.if %28 {
      %c0_29 = arith.constant 0 : index
      %c0_30 = arith.constant 0 : index
      %29 = vector.load %arg9[%c0_29, %c0_30] : memref<32x32xf32, #tpu.memory_space<vmem>>, vector<32x32xf32>
      %30 = arith.truncf %29 : vector<32x32xf32> to vector<32x32xbf16>
      %c0_31 = arith.constant 0 : index
      %c0_32 = arith.constant 0 : index
      %c0_33 = arith.constant 0 : index
      %c0_34 = arith.constant 0 : index
      %31 = vector.load %arg6[%c0_31, %c0_32, %c0_33, %c0_34] : memref<1x1x32x32xbf16, #tpu.memory_space<vmem>>, vector<1x1x32x32xbf16>
      %32 = vector.shape_cast %31 : vector<1x1x32x32xbf16> to vector<32x32xbf16>
      %33 = vector.shape_cast %30 : vector<32x32xbf16> to vector<1x1x32x32xbf16>
      tpu.vector_store %arg6[%c0_31, %c0_32, %c0_33, %c0_34], %33 {strides = array<i32>} : memref<1x1x32x32xbf16, #tpu.memory_space<vmem>>, vector<1x1x32x32xbf16>,
      %cst_35 = arith.constant dense<0.000000e+00> : vector<32xf32>
      %34 = vector.multi_reduction <add>, %29, %cst_35 [0] : vector<32x32xf32> to vector<32xf32>
      %35 = vector.shape_cast %34 : vector<32xf32> to vector<1x32xf32>
      %cst_36 = arith.constant 3.125000e-02 : f32
      %36 = vector.broadcast %cst_36 : f32 to vector<1x32xf32>
      %37 = arith.mulf %35, %36 : vector<1x32xf32>
      %c0_37 = arith.constant 0 : index
      %c0_38 = arith.constant 0 : index
      %c0_39 = arith.constant 0 : index
      %c0_40 = arith.constant 0 : index
      %38 = vector.load %arg7[%c0_37, %c0_38, %c0_39, %c0_40] : memref<1x1x1x32xf32, #tpu.memory_space<vmem>>, vector<1x1x1x32xf32>
      %39 = vector.shape_cast %38 : vector<1x1x1x32xf32> to vector<1x32xf32>
      %40 = vector.shape_cast %35 : vector<1x32xf32> to vector<1x1x1x32xf32>
      tpu.vector_store %arg7[%c0_37, %c0_38, %c0_39, %c0_40], %40 {strides = array<i32>} : memref<1x1x1x32xf32, #tpu.memory_space<vmem>>, vector<1x1x1x32xf32>,
      %41 = vector.broadcast %37 : vector<1x32xf32> to vector<32x32xf32>
      %42 = arith.subf %29, %41 : vector<32x32xf32>
      %43 = vector.broadcast %37 : vector<1x32xf32> to vector<32x32xf32>
      %44 = arith.subf %29, %43 : vector<32x32xf32>
      %45 = arith.mulf %42, %44 : vector<32x32xf32>
      %cst_41 = arith.constant dense<0.000000e+00> : vector<32xf32>
      %46 = vector.multi_reduction <add>, %45, %cst_41 [0] : vector<32x32xf32> to vector<32xf32>
      %47 = vector.shape_cast %46 : vector<32xf32> to vector<1x32xf32>
      %c0_42 = arith.constant 0 : index
      %c0_43 = arith.constant 0 : index
      %c0_44 = arith.constant 0 : index
      %c0_45 = arith.constant 0 : index
      %48 = vector.load %arg8[%c0_42, %c0_43, %c0_44, %c0_45] : memref<1x1x1x32xf32, #tpu.memory_space<vmem>>, vector<1x1x1x32xf32>
      %49 = vector.shape_cast %48 : vector<1x1x1x32xf32> to vector<1x32xf32>
      %50 = vector.shape_cast %47 : vector<1x32xf32> to vector<1x1x1x32xf32>
      tpu.vector_store %arg8[%c0_42, %c0_43, %c0_44, %c0_45], %50 {strides = array<i32>} : memref<1x1x1x32xf32, #tpu.memory_space<vmem>>, vector<1x1x1x32xf32>,
    } else {
    }
    return
  }
  func.func @transform_0(%arg0: i32, %arg1: i32, %arg2: i32, %arg3: i32) -> (i32, i32, i32, i32) {
    %0 = arith.addi %arg1, %arg3 : i32
    %c0_i32 = arith.constant 0 : i32
    %c0_i32_0 = arith.constant 0 : i32
    %c0_i32_1 = arith.constant 0 : i32
    return %arg0, %0, %c0_i32, %c0_i32_0 : i32, i32, i32, i32
  }
  func.func @transform_1(%arg0: i32, %arg1: i32, %arg2: i32, %arg3: i32) -> (i32, i32, i32, i32) {
    %c0_i32 = arith.constant 0 : i32
    %c0_i32_0 = arith.constant 0 : i32
    %c0_i32_1 = arith.constant 0 : i32
    return %arg3, %c0_i32, %c0_i32_0, %arg2 : i32, i32, i32, i32
  }
  func.func @transform_2(%arg0: i32, %arg1: i32, %arg2: i32, %arg3: i32) -> (i32, i32, i32, i32) {
    %c0_i32 = arith.constant 0 : i32
    %c0_i32_0 = arith.constant 0 : i32
    return %arg0, %arg1, %c0_i32, %arg2 : i32, i32, i32, i32
  }
  func.func @transform_3(%arg0: i32, %arg1: i32, %arg2: i32, %arg3: i32) -> (i32, i32, i32, i32) {
    %c0_i32 = arith.constant 0 : i32
    %c0_i32_0 = arith.constant 0 : i32
    return %arg0, %arg1, %c0_i32, %arg2 : i32, i32, i32, i32
  }
  func.func @transform_4(%arg0: i32, %arg1: i32, %arg2: i32, %arg3: i32) -> (i32, i32, i32, i32) {
    %c0_i32 = arith.constant 0 : i32
    %c0_i32_0 = arith.constant 0 : i32
    return %arg0, %arg1, %c0_i32, %arg2 : i32, i32, i32, i32
  }
}

</mosaic_0001>

<bundles_post_ra>
// kernel: tpu_custom_call.1
= control target key start
LH: loop header
LB: loop body
LE: loop exit
PB: predicated region body
PF: predicated region fallthrough
CT: control target
= control target key end

     0   :  { %10 = vsyncpa [#allocation4], 0  ;;  %s1609_s0 = inlined_call_operand.vmem [shape: bf16[2,34,34,32], index: 0, kind: input, shape index: {}]   ;;  %s1610_s1 = inlined_call_operand.vmem [shape: bf16[3,3,32,32], index: 1, kind: input, shape index: {}]   ;;  %s1611_s2 = inlined_call_operand.hbm [shape: bf16[2,32,32,32], index: 2, kind: output, shape index: {0}]   ;;  %s1612_s3 = inlined_call_operand.hbm [shape: f32[2,32,1,32], index: 3, kind: output, shape index: {1}]   ;;  %s1613_s4 = inlined_call_operand.hbm [shape: f32[2,32,1,32], index: 4, kind: output, shape index: {2}]  }
   0x1   :  { %12 = vsyncpa [#allocation4 + $0x1], 0 }
   0x2   :  { %13 = vsyncpa [#allocation6], 0 }
   0x3   :  { %15 = vsyncpa [#allocation6 + $0x1], 0  ;;  %s1305_s15 = smov 0   ;;  %s1307_s16 = smov 0  }
   0x4   :  { %s1309_s17 = smov 0   ;;  %s1311_s18 = smov 0  }
   0x5   :  { %s1313_s19 = smov 0   ;;  %s1315_s20 = smov 0  }
   0x6   :  { %s1317_s21 = smov 0   ;;  %s1319_s22 = smov 0  }
   0x7   :  { %s1321_s23 = smov 0   ;;  %s1323_s24 = smov 0  }
   0x8 LB: > { %1623 = sst [smem:[#allocation10_spill]] %s1240_s16  ;;  %s1615_s25 = sadd.s32 4294967295, %s1272_s24   ;;  %s1272_s24 = sphi %s1323_s24, %s21_s24   ;;  %s1268_s23 = sphi %s1321_s23, %s1644_s23   ;;  %s1264_s22 = sphi %s1319_s22, %s1643_s22   ;;  %s1260_s21 = sphi %s1317_s21, %s1642_s21   ;;  %s1256_s20 = sphi %s1315_s20, %s1641_s20   ;;  %s1252_s19 = sphi %s1313_s19, %s1640_s19   ;;  %s1248_s18 = sphi %s1311_s18, %s1639_s18   ;;  %s1244_s17 = sphi %s1309_s17, %s1638_s17   ;;  %s1240_s16 = sphi %s1307_s16, %s1637_s16   ;;  %s1236_s15 = sphi %s1305_s15, %s1636_s15  }
   0x9   : > { %1624 = sst [smem:[#allocation11_spill]] %s1244_s17  ;;  %s1614_s26 = sadd.s32 4294967294, %s1272_s24  }
   0xa   : > { %1625 = sst [smem:[#allocation12_spill]] %s1260_s21  ;;  %s36_s27 = sadd.s32 1, %s1260_s21 }
   0xb   : > { %1626 = sst [smem:[#allocation13_spill]] %s1264_s22  ;;  %p37_p0 = scmp.ge.s32.totalorder %s36_s27, 3 }
   0xc   : > { %1627 = sst [smem:[#allocation14_spill]] %s1268_s23  ;;  %s43_s28 = sadd.s32 1, %s1264_s22 }
   0xd   : > { %s47_s29 = sadd.s32 1, %s1268_s23  ;;  %p126_p1 = scmp.ne.s32.totalorder %s1244_s17, %s1240_s16 }
   0xe   : > { %s1646_s27 = smov (%p37_p0, %s36_s27), 0  ;;  %s1648_s28 = smov (!%p37_p0, %s43_s28), %s1264_s22 }
   0xf   : > { %1628 = sst [smem:[#allocation15_spill]] %s1646_s27  ;;  %p127_p2 = scmp.eq.s32.totalorder %s1615_s25, 191 }
  0x10   : > { %p132_p3 = scmp.ne.s32.totalorder %s1240_s16, %s1236_s15  ;;  %p45_p4 = scmp.ge.s32.totalorder %s1648_s28, 32 }
  0x11   : > { %p133_p5 = scmp.eq.s32.totalorder %s1614_s26, 191  ;;  %p1371_p6 = por %p127_p2, %p126_p1 }
  0x12   : > { %s1650_s28 = smov (%p45_p4, %s1648_s28), 0  ;;  %s1652_s29 = smov (!%p45_p4, %s47_s29), %s1268_s23 }
  0x13   : > { %1630 = sst [smem:[#allocation16_spill]] %s1650_s28  ;;  %p1378_p7 = por %p133_p5, %p132_p3 }
  0x14   : > { %p907_p8 = scmp.ge.s32.totalorder %s1272_s24, 1  ;;  %p49_p9 = scmp.ge.s32.totalorder %s1652_s29, 2 }
  0x15   : > { %p236_p10 = scmp.lt.s32.totalorder %s1272_s24, 193  ;;  %s110_s6 = ssub.s32 %s1264_s22, %s1650_s28 }
  0x16   : > { %s1654_s29 = smov (%p49_p9, %s1652_s29), 0  ;;  %s116_s9 = sadd.s32 1, %s1244_s17 }
  0x17   : > { %1632 = sst [smem:[#allocation17_spill]] %s1654_s29  ;;  %p237_p11 = pnand %p907_p8, %p236_p10 }
  0x18   : > { %s109_s7 = ssub.s32 %s1268_s23, %s1654_s29  ;;  %s1395_s11 = sand.u32 (!%p237_p11), 1, %s1240_s16  }
  0x19   : > { %s111_s8 = sor.u32 %s110_s6, %s109_s7  ;;  %240 = sbr.rel (%p237_p11) target bundleno = 419 (0x1a3), region = 28 }
  0x1a   : > { %p114_p12 = scmp.eq.s32.totalorder %s111_s8, 0  ;;  %s283_s12 = sadd.s32 (!%p237_p11), %s1248_s18, %s1252_s19 }
  0x1b   : > { %s908_s13 = sshll.u32 (!%p237_p11), %s1395_s11, 4  ;;  %p284_p13 = scmp.lt.s32.totalorder (!%p237_p11), %s1256_s20, 1 }
  0x1c   : > { %s1392_s10 = scalar_select %p114_p12, %s1244_s17, %s116_s9  }
  0x1d   : > { %p286_p0 = scmp.lt.s32.totalorder (!%p237_p11), %s283_s12, 33  ;;  %p294_p1 = scmp.lt.s32.totalorder (!%p237_p11), %s1248_s18, 2 }
  0x1e   : > { %1633 = sst [smem:[#allocation18_spill]] %s1392_s10  ;;  %s1414_s10 = scalar_lea.vmem (!%p237_p11), [#allocation3], %s908_s13 }
  0x1f   : > { %s276_s17 = scalar_lea.vmem (!%p237_p11), [#allocation5], %s1395_s11  ;;  %s282_s16 = scalar_lea.vmem (!%p237_p11), [#allocation7], %s1395_s11 }
  0x20   : > { %s285_s14 = scalar_select %p284_p13, %s1256_s20, 1 }
  0x21   : > { %s1656_s12 = smov (!%p286_p0, %s283_s12), 33  ;;  %p911_p2 = scmp.ne.s32.totalorder %s1248_s18, 0 }
  0x22   : > { %s991_s6 = smul.u32 170, %s285_s14  ;;  %vm307_vm0 = vcmask (!%p911_p2), 261120   ;;  %v1274_v0 = vmov (!%p911_p2), 0.0  }
  0x23   : > { %s990_s7 = smul.u32 5, %s1656_s12  ;;  %308 = vst.msk [vmem:[#allocation2] sm:$0xff] (!%p911_p2), %vm307_vm0, %v1274_v0  ;;  %309 = vst.msk [vmem:[#allocation2 + $0x8] sm:$0xff] (!%p911_p2), %vm307_vm0, %v1274_v0 }
  0x24   : > { %s295_s8 = scalar_select %p294_p1, %s1248_s18, 2 }
  0x25   : > { %s290_s9 = sadd.s32 %s991_s6, %s990_s7  ;;  %306 = sbr.rel (%p911_p2) target bundleno = 44 (0x2c), region = 32  ;;  %310 = vst.msk [vmem:[#allocation2 + $0x10] sm:$0xff] (!%p911_p2), %vm307_vm0, %v1274_v0  ;;  %311 = vst.msk [vmem:[#allocation2 + $0x18] sm:$0xff] (!%p911_p2), %vm307_vm0, %v1274_v0 }
  0x26   : > { %s909_s26 = sshll.u32 %s290_s9, 2  ;;  %s992_s25 = smul.u32 48, %s295_s8 }
  0x27   : > { %s1407_s27 = scalar_lea.vmem %s1609_s0, %s909_s26 }
  0x28   : > { %s1412_s21 = scalar_lea.vmem %s1610_s1, %s992_s25 }
  0x2c PF: > { %v1093_v1 = vld [vmem:[%s1412_s21] sm:$0xff]   ;;  %v1094_v2 = vld [vmem:[%s1412_s21 + $0x8] sm:$0xff]   ;;  %vm347_vm1 = vcmask 261120   ;;  %v1096_v4 = vld [vmem:[%s1412_s21 + $0x10] sm:$0xff]   ;;  %vm526_vm2 = vcmask 1046528   ;;  %p935_p3 = scmp.ne.s32.totalorder %s1248_s18, 2 }
  0x2d   : > { %966 = vmatprep.subr.bf16.mxu0 %v1093_v1  ;;  %v1095_v3 = vld [vmem:[%s1407_s27] sm:$0xff]   ;;  %v1097_v5 = vld [vmem:[%s1407_s27 + $0x8] sm:$0xff]   ;;  %974 = vmatprep.subr.bf16.mxu1 %v1096_v4  ;;  %v1098_v7 = vld [vmem:[%s1412_s21 + $0x18] sm:$0xff]   ;;  %vm423_vm3 = vsmask.f32 7424  ;;  %vm631_vm4 = vcmask (!%p935_p3), 257024  }
  0x2e   : > { %967 = vmatpush3.bf16.msra.mxu0 %v1093_v1  ;;  %970 = vmatprep.mubr.msk.bf16.mxu0 %vm347_vm1, %v1095_v3  ;;  %v424_v6 = vshrl.u32 %v1095_v3, 16  ;;  %v426_v8 = vshll.u32 %v1095_v3, 16  ;;  %v430_v9 = vshll.u32 %v1097_v5, 16  ;;  %v434_v10 = vshrl.u32 %v1097_v5, 16  ;;  %v1100_v14 = vld [vmem:[%s1412_s21 + $0x20] sm:$0xff]   ;;  %v1101_v17 = vld [vmem:[%s1412_s21 + $0x28] sm:$0xff]  }
  0x2f   : > { %968 = vmatprep.subr.bf16.mxu0 %v1094_v2  ;;  %975 = vmatpush3.bf16.msra.mxu1 %v1096_v4  ;;  %v1099_v12 = vld [vmem:[%s1407_s27 + $0x10] ss:$0 sps:$4 sm:$0x11]   ;;  %v527_v18 = vrot.slane %v1095_v3, 1  ;;  %v528_v19 = vrot.slane %v1097_v5, 1  ;;  %v317_v28 = vld [vmem:[#allocation2] sm:$0xff] }
  0x30   : > { %976 = vmatprep.subr.bf16.mxu1 %v1098_v7  ;;  %v428_v11 = vrot.slane %v426_v8, 1  ;;  %v432_v13 = vrot.slane %v430_v9, 1  ;;  %v438_v16 = vshll.u32 %v1099_v12, 16  ;;  %v530_v24 = vrot.slane %v1099_v12, 1  ;;  %v319_v27 = vld [vmem:[#allocation2 + $0x10] sm:$0xff]  ;;  %v320_v30 = vld [vmem:[#allocation2 + $0x18] sm:$0xff] }
  0x31   : > { %v529_v23 = vsel %vm526_vm2, %v527_v18, %v528_v19  ;;  %v318_v33 = vld [vmem:[#allocation2 + $0x8] sm:$0xff]  ;;  %vm650_vm5 = vcmask (!%p935_p3), 253952  }
  0x32   : > { %969 = vmatpush3.bf16.msra.mxu0 %v1094_v2  ;;  %v429_v15 = vor.u32 %v428_v11, %v424_v6  ;;  %v436_v20 = vor.u32 %v434_v10, %v432_v13  ;;  %v440_v22 = vrot.slane %v438_v16, 1  ;;  %v531_v26 = vsel %vm526_vm2, %v528_v19, %v530_v24 }
  0x33   : > { %977 = vmatpush3.bf16.msra.mxu1 %v1098_v7  ;;  %982 = vmatprep.subr.bf16.mxu0 %v1100_v14 }
  0x34   : > { %v433_v21 = vsel %vm423_vm3, %v429_v15, %v432_v13  ;;  %v441_v25 = vsel %vm423_vm3, %v436_v20, %v440_v22 }
  0x35   : > { %971 = vmatmul.mubr.msk.bf16.vlgmr.msra.gmra.mrb[0].mxu0 %vm347_vm1, %v1097_v5  ;;  %978 = vmatprep.mubr.msk.bf16.mxu1 %vm347_vm1, %v433_v21 }
  0x36   : > { %983 = vmatpush3.bf16.msra.mxu0 %v1100_v14  ;;  %986 = vmatprep.mubr.msk.bf16.mxu0 %vm347_vm1, %v529_v23 }
  0x37   : > { %984 = vmatprep.subr.bf16.mxu0 %v1101_v17  ;;  %979 = vmatmul.mubr.msk.bf16.vlgmr.msra.gmra.mrb[0].mxu1 %vm347_vm1, %v441_v25 }
  0x3a   : > { %985 = vmatpush3.bf16.msra.mxu0 %v1101_v17 }
  0x3d   : > { %987 = vmatmul.mubr.msk.bf16.vlgmr.msra.gmra.mrb[4].mxu0 %vm347_vm1, %v531_v26 }
 0x108   : > { %v972_v29 = vpop.f32.mrb[0].mxu0 }
 0x109   : > { %v405_v31 = vadd.f32 %v972_v29, %v319_v27  ;;  %v388_v32 = vpop.f32.mrb[1].mxu0 }
 0x10a   : > { %v403_v34 = vadd.f32 %v388_v32, %v317_v28  ;;  %v973_v35 = vpop.f32.mrb[2].mxu0  ;;  %v980_v39 = vpop.f32.mrb[0].mxu1 }
 0x10b   : > { %409 = vst.msk [vmem:[#allocation2 + $0x10] sm:$0xff] %vm347_vm1, %v405_v31  ;;  %v406_v36 = vadd.f32 %v973_v35, %v320_v30  ;;  %v391_v37 = vpop.f32.mrb[3].mxu0  ;;  %v494_v40 = vpop.f32.mrb[1].mxu1 }
 0x10c   : > { %407 = vst.msk [vmem:[#allocation2] sm:$0xff] %vm347_vm1, %v403_v34  ;;  %v404_v38 = vadd.f32 %v391_v37, %v318_v33  ;;  %v981_v41 = vpop.f32.mrb[2].mxu1 }
 0x10d   : > { %410 = vst.msk [vmem:[#allocation2 + $0x18] sm:$0xff] %vm347_vm1, %v406_v36  ;;  %v497_v42 = vpop.f32.mrb[3].mxu1 }
 0x10e   : > { %408 = vst.msk [vmem:[#allocation2 + $0x8] sm:$0xff] %vm347_vm1, %v404_v38 }
 0x110   : > { %v988_v43 = vpop.f32.mrb[4].mxu0 }
 0x111   : > { %v584_v45 = vpop.f32.mrb[5].mxu0 }
 0x112   : > { %v413_v44 = vld [vmem:[#allocation2 + $0x10] sm:$0xff]  ;;  %v989_v48 = vpop.f32.mrb[6].mxu0 }
 0x113   : > { %v511_v46 = vadd.f32 %v980_v39, %v413_v44  ;;  %v411_v47 = vld [vmem:[#allocation2] sm:$0xff]  ;;  %v587_v51 = vpop.f32.mrb[7].mxu0 }
 0x114   : > { %v509_v49 = vadd.f32 %v494_v40, %v411_v47  ;;  %v414_v50 = vld [vmem:[#allocation2 + $0x18] sm:$0xff] }
 0x115   : > { %515 = vst.msk [vmem:[#allocation2 + $0x10] sm:$0xff] %vm347_vm1, %v511_v46  ;;  %v512_v52 = vadd.f32 %v981_v41, %v414_v50  ;;  %v412_v53 = vld [vmem:[#allocation2 + $0x8] sm:$0xff] }
 0x116   : > { %513 = vst.msk [vmem:[#allocation2] sm:$0xff] %vm347_vm1, %v509_v49  ;;  %v510_v54 = vadd.f32 %v497_v42, %v412_v53 }
 0x117   : > { %516 = vst.msk [vmem:[#allocation2 + $0x18] sm:$0xff] %vm347_vm1, %v512_v52 }
 0x118   : > { %514 = vst.msk [vmem:[#allocation2 + $0x8] sm:$0xff] %vm347_vm1, %v510_v54 }
 0x11c   : > { %v519_v55 = vld [vmem:[#allocation2 + $0x10] sm:$0xff]  ;;  %610 = sbr.rel (%p935_p3) target bundleno = 343 (0x157), region = 36 }
 0x11d   : > { %v601_v56 = vadd.f32 %v988_v43, %v519_v55  ;;  %v517_v57 = vld [vmem:[#allocation2] sm:$0xff] }
 0x11e   : > { %v599_v58 = vadd.f32 %v584_v45, %v517_v57  ;;  %v520_v59 = vld [vmem:[#allocation2 + $0x18] sm:$0xff] }
 0x11f   : > { %605 = vst.msk [vmem:[#allocation2 + $0x10] sm:$0xff] %vm347_vm1, %v601_v56  ;;  %v602_v60 = vadd.f32 %v989_v48, %v520_v59  ;;  %v518_v61 = vld [vmem:[#allocation2 + $0x8] sm:$0xff] }
 0x120   : > { %603 = vst.msk [vmem:[#allocation2] sm:$0xff] %vm347_vm1, %v599_v58  ;;  %v600_v62 = vadd.f32 %v587_v51, %v518_v61 }
 0x121   : > { %606 = vst.msk [vmem:[#allocation2 + $0x18] sm:$0xff] %vm347_vm1, %v602_v60 }
 0x122   : > { %604 = vst.msk [vmem:[#allocation2 + $0x8] sm:$0xff] %vm347_vm1, %v600_v62 }
 0x126   : > { %v613_v1 = vld [vmem:[#allocation2 + $0x10] sm:$0xff] }
 0x127   : > { %v611_v63 = vld [vmem:[#allocation2] sm:$0xff]  ;;  %v952_v8 = vpack.c.bf16 %v613_v1, %v613_v1  ;;  %v639_v9 = vsel %vm347_vm1, %v613_v1, 0.0 }
 0x128   : > { %v950_v2 = vpack.c.bf16 %v611_v63, %v611_v63  ;;  %v636_v3 = vsel %vm347_vm1, %v611_v63, 0.0  ;;  %v614_v6 = vld [vmem:[#allocation2 + $0x18] sm:$0xff] }
 0x129   : > { %v612_v0 = vld [vmem:[#allocation2 + $0x8] sm:$0xff]  ;;  %v953_v10 = vpack.c.bf16 %v614_v6, %v614_v6  ;;  %v641_v11 = vsel %vm347_vm1, %v614_v6, 0.0  ;;  %634 = vst.msk [vmem:[%s1414_s10 + $0x8] sm:$0xf] %vm631_vm4, %v952_v8 }
 0x12a   : > { %v951_v4 = vpack.c.bf16 %v612_v0, %v612_v0  ;;  %v637_v5 = vsel %vm347_vm1, %v612_v0, 0.0  ;;  %632 = vst.msk [vmem:[%s1414_s10] sm:$0xf] %vm631_vm4, %v950_v2 }
 0x12b   : > { %v638_v7 = vadd.f32 %v637_v5, %v636_v3  ;;  %635 = vst.msk [vmem:[%s1414_s10 + $0xc] sm:$0xf] %vm631_vm4, %v953_v10 }
 0x12c   : > { %633 = vst.msk [vmem:[%s1414_s10 + $0x4] sm:$0xf] %vm631_vm4, %v951_v4 }
 0x12d   : > { %v640_v12 = vadd.f32 %v639_v9, %v638_v7 }
 0x12f   : > { %v642_v13 = vadd.f32 %v641_v11, %v640_v12 }
 0x131   : > { %v643_v14 = vrot.slane %v642_v13, 4 }
 0x133   : > { %v644_v15 = vadd.f32 %v643_v14, %v642_v13 }
 0x135   : > { %v645_v16 = vrot.slane %v644_v15, 2 }
 0x137   : > { %v646_v17 = vadd.f32 %v645_v16, %v644_v15 }
 0x139   : > { %v647_v18 = vrot.slane %v646_v17, 1 }
 0x13b   : > { %v648_v19 = vadd.f32 %v647_v18, %v646_v17 }
 0x13d   : > { %v649_v20 = vmul.f32 0.03125, %v648_v19  ;;  %651 = vst.msk [vmem:[%s276_s17] sm:$0x1] %vm650_vm5, %v648_v19 }
 0x13f   : > { %v652_v21 = vsub.f32 %v611_v63, %v649_v20  ;;  %v653_v22 = vsub.f32 %v612_v0, %v649_v20  ;;  %v654_v23 = vsub.f32 %v613_v1, %v649_v20  ;;  %v655_v24 = vsub.f32 %v614_v6, %v649_v20 }
 0x141   : > { %v656_v25 = vmul.f32 %v652_v21, %v652_v21  ;;  %v657_v26 = vmul.f32 %v653_v22, %v653_v22  ;;  %v658_v27 = vmul.f32 %v654_v23, %v654_v23  ;;  %v659_v28 = vmul.f32 %v655_v24, %v655_v24 }
 0x143   : > { %v660_v29 = vsel %vm347_vm1, %v656_v25, 0.0  ;;  %v661_v30 = vsel %vm347_vm1, %v657_v26, 0.0  ;;  %v663_v31 = vsel %vm347_vm1, %v658_v27, 0.0  ;;  %v665_v33 = vsel %vm347_vm1, %v659_v28, 0.0 }
 0x144   : > { %v662_v32 = vadd.f32 %v661_v30, %v660_v29 }
 0x146   : > { %v664_v34 = vadd.f32 %v663_v31, %v662_v32 }
 0x148   : > { %v666_v35 = vadd.f32 %v665_v33, %v664_v34 }
 0x14a   : > { %v667_v36 = vrot.slane %v666_v35, 4 }
 0x14c   : > { %v668_v37 = vadd.f32 %v667_v36, %v666_v35 }
 0x14e   : > { %v669_v38 = vrot.slane %v668_v37, 2 }
 0x150   : > { %v670_v39 = vadd.f32 %v669_v38, %v668_v37 }
 0x152   : > { %v671_v40 = vrot.slane %v670_v39, 1 }
 0x154   : > { %v672_v41 = vadd.f32 %v671_v40, %v670_v39 }
 0x156   : > { %673 = vst.msk [vmem:[%s282_s16] sm:$0x1] %vm650_vm5, %v672_v41 }
 0x157 PF: > { %s1634_s18 = sadd.s32 4294967295, %s1272_s24   ;;  %s944_s22 = sshll.u32 %s1256_s20, 5 }
 0x158   : > { %s1475_s21 = sand.u32 1, %s1634_s18   ;;  %s1479_s23 = sadd.s32 %s1252_s19, %s944_s22 }
 0x159   : > { %s945_s25 = sshll.u32 %s1479_s23, 4  ;;  %s718_s26 = sshll.u32 %s276_s17, 4  ;;  %s719_s26 = int_to_ptr.vmem [resolvable:$true] %s718_s26 }
 0x15a   : > { %s1489_s29 = scalar_lea.hbm %s1612_s3, %s945_s25  ;;  %s680_s12 = scalar_lea.sflag [#allocation6], %s1475_s21 }
 0x15b   : > { %s1102_s13 = scalar_lea.vmem %s719_s26, 16  ;;  %s1275_s14 = smov [#allocation5]  }
 0x15c   : > { %p1103_p4 = scmp.ne.s32.totalorder %s719_s26, %s1102_s13  ;;  %s1106_s6 = sshll.u32 %s1275_s14, 4  ;;  %s1107_s6 = int_to_ptr.vmem [resolvable:$false] %s1106_s6 }
 0x15d   : > { %s1108_s7 = scalar_lea.vmem %s1107_s6, 32  ;;  %p1109_p9 = scmp.lt.s32.totalorder %s719_s26, %s1107_s6 }
 0x15e   : > { %p1104_p5 = pnand %p1103_p4, %p1371_p6  ;;  %p1110_p10 = scmp.lt.s32.totalorder %s1108_s7, %s1102_s13 }
 0x160   : > { %p1105_p8 = pneg %p1104_p5  ;;  %p1111_p11 = por %p1110_p10, %p1109_p9 }
 0x162   : > { %p1112_p12 = pnand %p1111_p11, %p1105_p8 }
 0x164   : > { %1115 = shalt.err (!%p1112_p12)
}
 0x165   : > { %s1116_s17 = scalar_lea.hbm %s1489_s29, 16  ;;  %s1120_s18 = scalar_lea.hbm %s1612_s3, 1024 }
 0x166   : > { %p1117_p13 = scmp.ne.s32.totalorder %s1489_s29, %s1116_s17  ;;  %p1121_p2 = scmp.lt.u32.totalorder %s1489_s29, %s1612_s3 }
 0x167   : > { %p1122_p3 = scmp.lt.u32.totalorder %s1120_s18, %s1116_s17  ;;  %p1124_p5 = scmp.lt.u32.totalorder %s1116_s17, %s1489_s29 }
 0x168   : > { %p1118_p0 = pnand %p1117_p13, %p1371_p6 }
 0x169   : > { %p1123_p4 = por %p1122_p3, %p1121_p2 }
 0x16a   : > { %p1119_p1 = pneg %p1118_p0 }
 0x16b   : > { %p1125_p8 = por %p1124_p5, %p1123_p4 }
 0x16d   : > { %p1126_p9 = pnand %p1125_p8, %p1119_p1 }
 0x16f   : > { %1129 = shalt.err (!%p1126_p9)
}
 0x170   : > { %994 = dma.vmem_to_hbm [thread:$0]  (%p1371_p6), %s719_s26, 16, %s1489_s29, %s680_s12  }
 0x171   : > { %s941_s28 = sshll.u32 %s1252_s19, 2  ;;  %s942_s13 = sshll.u32 %s1256_s20, 7 }
 0x172   : > { %s699_s14 = sshll.u32 %s1414_s10, 4  ;;  %s696_s6 = sadd.s32 %s942_s13, %s941_s28  ;;  %s1514_s14 = int_to_ptr.vmem [resolvable:$true] %s699_s14 }
 0x173   : > { %s943_s7 = sshll.u32 %s696_s6, 6  ;;  %s675_s18 = scalar_lea.sflag [#allocation4], %s1395_s11 }
 0x174   : > { %s1519_s9 = scalar_lea.hbm %s1611_s2, %s943_s7  ;;  %s1130_s22 = scalar_lea.vmem %s1514_s14, 256 }
 0x175   : > { %p1131_p10 = scmp.ne.s32.totalorder %s1514_s14, %s1130_s22  ;;  %s1276_s19 = smov [#allocation3]  }
 0x176   : > { %s1134_s20 = sshll.u32 %s1276_s19, 4  ;;  %s1135_s20 = int_to_ptr.vmem [resolvable:$false] %s1134_s20 }
 0x177   : > { %p1132_p11 = pnand %p1131_p10, %p1371_p6  ;;  %s1136_s10 = scalar_lea.vmem %s1135_s20, 512 }
 0x178   : > { %p1137_p13 = scmp.lt.s32.totalorder %s1514_s14, %s1135_s20  ;;  %p1138_p0 = scmp.lt.s32.totalorder %s1136_s10, %s1130_s22 }
 0x179   : > { %p1133_p12 = pneg %p1132_p11 }
 0x17a   : > { %p1139_p1 = por %p1138_p0, %p1137_p13 }
 0x17c   : > { %p1140_p2 = pnand %p1139_p1, %p1133_p12 }
 0x17e   : > { %1143 = shalt.err (!%p1140_p2)
}
 0x17f   : > { %s1144_s26 = scalar_lea.hbm %s1519_s9, 256  ;;  %s1148_s28 = scalar_lea.hbm %s1611_s2, 16384 }
 0x180   : > { %p1145_p3 = scmp.ne.s32.totalorder %s1519_s9, %s1144_s26  ;;  %p1149_p8 = scmp.lt.u32.totalorder %s1519_s9, %s1611_s2 }
 0x181   : > { %p1150_p9 = scmp.lt.u32.totalorder %s1148_s28, %s1144_s26  ;;  %p1152_p11 = scmp.lt.u32.totalorder %s1144_s26, %s1519_s9 }
 0x182   : > { %p1146_p4 = pnand %p1145_p3, %p1371_p6 }
 0x183   : > { %p1151_p10 = por %p1150_p9, %p1149_p8 }
 0x184   : > { %p1147_p5 = pneg %p1146_p4 }
 0x185   : > { %p1153_p12 = por %p1152_p11, %p1151_p10 }
 0x187   : > { %p1154_p13 = pnand %p1153_p12, %p1147_p5 }
 0x189   : > { %1157 = shalt.err (!%p1154_p13)
}
 0x18a   : > { %s1277_s7 = smov 64   ;;  %s1278_s17 = smov 4  }
 0x18b   : > { %993 = dma.vmem_to_hbm [thread:$0]  (%p1371_p6), %s1514_s14, 256, %s1519_s9, %s675_s18, %s1277_s7, %s1277_s7, %s1278_s17  }
 0x18c   : > { %s1550_s19 = scalar_lea.hbm %s1613_s4, %s945_s25  ;;  %s734_s20 = sshll.u32 %s282_s16, 4  ;;  %s735_s20 = int_to_ptr.vmem [resolvable:$true] %s734_s20 }
 0x18d   : > { %s1158_s10 = scalar_lea.vmem %s735_s20, 16  ;;  %s1279_s26 = smov [#allocation7]  }
 0x18e   : > { %p1159_p0 = scmp.ne.s32.totalorder %s735_s20, %s1158_s10  ;;  %s1162_s29 = sshll.u32 %s1279_s26, 4  ;;  %s1163_s29 = int_to_ptr.vmem [resolvable:$false] %s1162_s29 }
 0x18f   : > { %s1164_s27 = scalar_lea.vmem %s1163_s29, 32  ;;  %p1165_p3 = scmp.lt.s32.totalorder %s735_s20, %s1163_s29 }
 0x190   : > { %p1160_p1 = pnand %p1159_p0, %p1371_p6  ;;  %p1166_p4 = scmp.lt.s32.totalorder %s1164_s27, %s1158_s10 }
 0x192   : > { %p1161_p2 = pneg %p1160_p1  ;;  %p1167_p5 = por %p1166_p4, %p1165_p3 }
 0x194   : > { %p1168_p8 = pnand %p1167_p5, %p1161_p2 }
 0x196   : > { %1171 = shalt.err (!%p1168_p8)
}
 0x197   : > { %s1172_s16 = scalar_lea.hbm %s1550_s19, 16  ;;  %s1176_s25 = scalar_lea.hbm %s1613_s4, 1024 }
 0x198   : > { %p1173_p9 = scmp.ne.s32.totalorder %s1550_s19, %s1172_s16  ;;  %p1177_p12 = scmp.lt.u32.totalorder %s1550_s19, %s1613_s4 }
 0x199   : > { %p1178_p13 = scmp.lt.u32.totalorder %s1176_s25, %s1172_s16  ;;  %p1180_p1 = scmp.lt.u32.totalorder %s1172_s16, %s1550_s19 }
 0x19a   : > { %p1174_p10 = pnand %p1173_p9, %p1371_p6 }
 0x19b   : > { %p1179_p0 = por %p1178_p13, %p1177_p12 }
 0x19c   : > { %p1175_p11 = pneg %p1174_p10 }
 0x19d   : > { %p1181_p2 = por %p1180_p1, %p1179_p0 }
 0x19f   : > { %p1182_p3 = pnand %p1181_p2, %p1175_p11 }
 0x1a1   : > { %1185 = shalt.err (!%p1182_p3)
}
 0x1a2   : > { %995 = dma.vmem_to_hbm [thread:$0]  (%p1371_p6), %s735_s20, 16, %s1550_s19, %s680_s12  }
 0x1a3 PF: > { %p1009_p4 = scmp.ge.s32.totalorder %s1272_s24, 2  ;;  %s746_s18 = sand.u32 1, %s1236_s15  }
 0x1a4   : > { %s747_s28 = scalar_lea.sflag [#allocation4], %s746_s18 }
 0x1a5   : > { %p1000_p5 = pnand %p1009_p4, %p1378_p7 }
 0x1a7   : > { %1227 = dma.done.wait (!%p1000_p5), %s747_s28, 256  }
 0x1a8   : > { %1229 = vsyncadd (!%p1000_p5), %s747_s28, 4294967040  ;;  %s1635_s13 = sadd.s32 4294967294, %s1272_s24  }
 0x1a9   : > { %s755_s6 = sand.u32 1, %s1635_s13  }
 0x1aa   : > { %s756_s7 = scalar_lea.sflag [#allocation6], %s755_s6 }
 0x1ab   : > { %1231 = dma.done.wait (!%p1000_p5), %s756_s7, 32  }
 0x1ac   : > { %1233 = vsyncadd (!%p1000_p5), %s756_s7, 4294967264  ;;  %s21_s24 = sadd.s32 1, %s1272_s24   ;;  %s1636_s15 = sld [smem:[#allocation10_spill]] }
 0x1ad   : > { %p18_p6 = scmp.ge.s32.totalorder %s21_s24, 194   ;;  %s1637_s16 = sld [smem:[#allocation11_spill]] }
 0x1ae   : > { %s1638_s17 = sld [smem:[#allocation18_spill]]  ;;  %s1639_s18 = sld [smem:[#allocation12_spill]] }
 0x1af   : > { %s1640_s19 = sld [smem:[#allocation13_spill]]  ;;  %s1641_s20 = sld [smem:[#allocation14_spill]] }
 0x1b0   : > { %s1642_s21 = sld [smem:[#allocation15_spill]]  ;;  %s1643_s22 = sld [smem:[#allocation16_spill]] }
 0x1b1   : > { %s1644_s23 = sld [smem:[#allocation17_spill]]  ;;  %20 = sbr.rel (!%p18_p6) target bundleno = 8 (0x8), region = 108 }
 0x1b8   :  { %768 = vsyncpa [#allocation4], 1 }
 0x1b9   :  { %770 = vsyncpa [#allocation4 + $0x1], 1 }
 0x1ba   :  { %771 = vsyncpa [#allocation6], 1 }
 0x1bb   :  { %773 = vsyncpa [#allocation6 + $0x1], 1 }

</bundles_post_ra>
